<compile_context>
chip_gen: v7x
topology: tpu7x:2x2x1
jax: 0.10.0
libtpu: 0.0.40
codegen_flags: <defaults>
</compile_context>

<pallas_src>
import functools

import jax
import jax.numpy as jnp
from jax.experimental import pallas as pl
from jax.experimental.pallas import tpu as pltpu


def _ssp(x):
    # shifted softplus: softplus(x) - log(2), computed in f32
    return jax.nn.softplus(x) - jnp.log(2.0)


def _round_up(n, m):
    return ((n + m - 1) // m) * m


def atomic_property_kernel(x_ref, w1_ref, b1_ref, w2_ref, b2_ref,
                           w3_ref, b3_ref, o_ref):
    # x tile: (tm, F) (bf16 or f32); all weights fully resident in VMEM.
    x = x_ref[...]
    h = jnp.dot(x, w1_ref[...], preferred_element_type=jnp.float32) + b1_ref[...]
    h = _ssp(h)                                           # f32 (tm, 128)
    h = jnp.dot(h.astype(w2_ref.dtype), w2_ref[...],
                preferred_element_type=jnp.float32) + b2_ref[...]
    h = _ssp(h)                                           # f32 (tm, 64)
    # Dense(64 -> 1), produced lane-dense: (1, 64) @ (64, tm) -> (1, tm).
    y = jnp.dot(w3_ref[...], h.T, preferred_element_type=jnp.float32)
    o_ref[...] = (y + b3_ref[0]).astype(o_ref.dtype)
    # TODO(synk): dropout (train-mode stochastic masking) not implemented; this
    # is the eval-mode forward (dropout == identity).


def atomic_property(x, params, *, tm=256, use_bf16=True):
    """x: [M, n_features] float32 -> [M, 1] float32."""
    M, F = x.shape
    w1, b1, w2, b2, w3, b3 = params
    H1 = w1.shape[1]
    H2 = w2.shape[1]

    # Clamp the row tile for small inputs (keep a sublane multiple); for large
    # inputs keep tm=256 so the grid has many programs (keeps both v7x
    # TensorCores busy via the "parallel" axis). Pad rows to a tile multiple.
    tm = max(8, min(tm, _round_up(M, 8)))
    Mp = _round_up(M, tm)
    if Mp != M:
        x = jnp.pad(x, ((0, Mp - M), (0, 0)))
    n_blocks = Mp // tm

    # bf16 matmul inputs (f32 accumulate); activations / biases stay f32.
    mm_dtype = jnp.bfloat16 if use_bf16 else x.dtype
    x_in = x.astype(mm_dtype)
    w1_in = w1.astype(mm_dtype)
    w2_in = w2.astype(mm_dtype)
    w3_row = w3.reshape(1, -1).astype(jnp.float32)    # (1, 64)
    b3_smem = b3.reshape(-1).astype(jnp.float32)      # (1,) scalar in SMEM

    out = pl.pallas_call(
        atomic_property_kernel,
        out_shape=jax.ShapeDtypeStruct((n_blocks, tm), jnp.float32),
        grid_spec=pltpu.PrefetchScalarGridSpec(
            num_scalar_prefetch=0,
            grid=(n_blocks,),
            in_specs=[
                pl.BlockSpec((tm, F), lambda i: (i, 0)),      # x rows tile
                pl.BlockSpec((F, H1), lambda i: (0, 0)),      # W1 (resident)
                pl.BlockSpec((1, H1), lambda i: (0, 0)),      # b1
                pl.BlockSpec((H1, H2), lambda i: (0, 0)),     # W2 (resident)
                pl.BlockSpec((1, H2), lambda i: (0, 0)),      # b2
                pl.BlockSpec((1, H2), lambda i: (0, 0)),      # W3 row
                pl.BlockSpec(memory_space=pltpu.MemorySpace.SMEM),  # b3 scalar
            ],
            out_specs=pl.BlockSpec((1, tm), lambda i: (i, 0)),  # lane-dense
        ),
        compiler_params=pltpu.CompilerParams(
            dimension_semantics=("parallel",)),
    )(x_in, w1_in, b1, w2_in, b2, w3_row, b3_smem)

    # (n_blocks, tm) -> (M, 1), dropping the padded rows.
    return out.reshape(-1)[:M].reshape(M, 1)


def init_params(key, n_features):
    """Deterministic synthetic parameters (PyTorch Linear shape conventions,
    stored transposed so the math is x @ W)."""
    ks = jax.random.split(key, 6)
    w1 = jax.random.normal(ks[0], (n_features, 128), jnp.float32) * 0.1
    b1 = jax.random.normal(ks[1], (1, 128), jnp.float32) * 0.1
    w2 = jax.random.normal(ks[2], (128, 64), jnp.float32) * 0.1
    b2 = jax.random.normal(ks[3], (1, 64), jnp.float32) * 0.1
    w3 = jax.random.normal(ks[4], (64, 1), jnp.float32) * 0.1
    b3 = jax.random.normal(ks[5], (1, 1), jnp.float32) * 0.1
    return (w1, b1, w2, b2, w3, b3)


def atomic_property_ref(x, params, *, use_bf16=True):
    """Pure-JAX reference with the same mixed-precision policy as the kernel."""
    w1, b1, w2, b2, w3, b3 = params
    dot = functools.partial(jnp.dot, precision=jax.lax.Precision.HIGHEST)
    if use_bf16:
        rt = lambda t: t.astype(jnp.bfloat16).astype(jnp.float32)
        x, w1, w2 = rt(x), rt(w1), rt(w2)
    h = _ssp(dot(x, w1) + b1)
    if use_bf16:
        h = h.astype(jnp.bfloat16).astype(jnp.float32)
    h = _ssp(dot(h, w2) + b2)
    return dot(h, w3) + b3


if __name__ == "__main__":
    key = jax.random.PRNGKey(0)
    k_x, k_p = jax.random.split(key)

    batch, n_atoms, n_features = 2, 8, 32
    # a: [batch, n_atoms, n_features] -> flatten atoms to rows for the kernel
    a = jax.random.normal(k_x, (batch, n_atoms, n_features), jnp.float32)
    x = a.reshape(batch * n_atoms, n_features)

    params = init_params(k_p, n_features)

    out = atomic_property(x, params)           # default tm clamps for small M
    out = jax.block_until_ready(out)

    ref = atomic_property_ref(x, params)
    assert out.shape == (batch * n_atoms, 1)
    assert jnp.allclose(out, ref, atol=5e-3, rtol=5e-3), (
        float(jnp.max(jnp.abs(out - ref))))

    # final per-atom property, reshaped back to [batch, n_atoms, 1]
    _ = out.reshape(batch, n_atoms, 1)

    print("KERNEL_OK")
</pallas_src>

<mosaic_0001>
module attributes {stable_mosaic.version = 11 : i64} {
  func.func @atomic_property_kernel(%arg0: i32, %arg1: memref<16x32xbf16, #tpu.memory_space<vmem>>, %arg2: memref<32x128xbf16, #tpu.memory_space<vmem>>, %arg3: memref<1x128xf32, #tpu.memory_space<vmem>>, %arg4: memref<128x64xbf16, #tpu.memory_space<vmem>>, %arg5: memref<1x64xf32, #tpu.memory_space<vmem>>, %arg6: memref<1x64xf32, #tpu.memory_space<vmem>>, %arg7: memref<1xf32, #tpu.memory_space<smem>>, %arg8: memref<1x16xf32, #tpu.memory_space<vmem>>) attributes {dimension_semantics = [#tpu.dimension_semantics<parallel>], iteration_bounds = array<i64: 1>, scalar_prefetch = 0 : i64, scratch_operands = 0 : i64, tpu.core_type = #tpu.core_type<tc>, window_params = [{transform_indices = @transform_0, window_bounds = array<i64: 16, 32>}, {pipeline_mode = #tpu.pipeline_mode<synchronous>, transform_indices = @transform_1, window_bounds = array<i64: 32, 128>}, {pipeline_mode = #tpu.pipeline_mode<synchronous>, transform_indices = @transform_2, window_bounds = array<i64: 1, 128>}, {pipeline_mode = #tpu.pipeline_mode<synchronous>, transform_indices = @transform_3, window_bounds = array<i64: 128, 64>}, {pipeline_mode = #tpu.pipeline_mode<synchronous>, transform_indices = @transform_4, window_bounds = array<i64: 1, 64>}, {pipeline_mode = #tpu.pipeline_mode<synchronous>, transform_indices = @transform_5, window_bounds = array<i64: 1, 64>}, {transform_indices = @transform_6, window_bounds = array<i64: 1>}, {transform_indices = @transform_7, window_bounds = array<i64: 1, 16>}]} {
    %c0 = arith.constant 0 : index
    %c0_0 = arith.constant 0 : index
    %0 = vector.load %arg1[%c0, %c0_0] : memref<16x32xbf16, #tpu.memory_space<vmem>>, vector<16x32xbf16>
    %c0_1 = arith.constant 0 : index
    %c0_2 = arith.constant 0 : index
    %1 = vector.load %arg2[%c0_1, %c0_2] : memref<32x128xbf16, #tpu.memory_space<vmem>>, vector<32x128xbf16>
    %cst = arith.constant dense<0.000000e+00> : vector<16x128xf32>
    %2 = tpu.matmul %0, %1, %cst {dimension_numbers = #tpu.dot_dimension_numbers<[1], [0], [0], [1], [0, 0, 1, 1], [], []>} : vector<16x32xbf16>, vector<32x128xbf16>, vector<16x128xf32> -> vector<16x128xf32>
    %c0_3 = arith.constant 0 : index
    %c0_4 = arith.constant 0 : index
    %3 = vector.load %arg3[%c0_3, %c0_4] : memref<1x128xf32, #tpu.memory_space<vmem>>, vector<1x128xf32>
    %4 = vector.broadcast %3 : vector<1x128xf32> to vector<16x128xf32>
    %5 = arith.addf %2, %4 : vector<16x128xf32>
    %cst_5 = arith.constant 0.000000e+00 : f32
    %6 = vector.broadcast %cst_5 : f32 to vector<16x128xf32>
    %7 = arith.maximumf %5, %6 : vector<16x128xf32>
    %8 = vector.broadcast %cst_5 : f32 to vector<16x128xf32>
    %9 = arith.subf %5, %8 : vector<16x128xf32>
    %10 = arith.cmpf one, %9, %9 : vector<16x128xf32>
    %11 = vector.broadcast %cst_5 : f32 to vector<16x128xf32>
    %12 = arith.addf %5, %11 : vector<16x128xf32>
    %13 = math.absf %9 : vector<16x128xf32>
    %cst_6 = arith.constant 0.000000e+00 : f32
    %14 = vector.broadcast %cst_6 : f32 to vector<16x128xf32>
    %15 = arith.subf %14, %13 : vector<16x128xf32>
    %16 = math.exp %15 : vector<16x128xf32>
    %17 = math.log1p %16 : vector<16x128xf32>
    %18 = arith.addf %7, %17 : vector<16x128xf32>
    %19 = arith.select %10, %12, %18 : vector<16x128xi1>, vector<16x128xf32>
    %cst_7 = arith.constant 2.000000e+00 : f32
    %20 = math.log %cst_7 : f32
    %21 = vector.broadcast %20 : f32 to vector<16x128xf32>
    %22 = arith.subf %19, %21 : vector<16x128xf32>
    %23 = arith.truncf %22 : vector<16x128xf32> to vector<16x128xbf16>
    %c0_8 = arith.constant 0 : index
    %c0_9 = arith.constant 0 : index
    %24 = vector.load %arg4[%c0_8, %c0_9] : memref<128x64xbf16, #tpu.memory_space<vmem>>, vector<128x64xbf16>
    %cst_10 = arith.constant dense<0.000000e+00> : vector<16x64xf32>
    %25 = tpu.matmul %23, %24, %cst_10 {dimension_numbers = #tpu.dot_dimension_numbers<[1], [0], [0], [1], [0, 0, 1, 1], [], []>} : vector<16x128xbf16>, vector<128x64xbf16>, vector<16x64xf32> -> vector<16x64xf32>
    %c0_11 = arith.constant 0 : index
    %c0_12 = arith.constant 0 : index
    %26 = vector.load %arg5[%c0_11, %c0_12] : memref<1x64xf32, #tpu.memory_space<vmem>>, vector<1x64xf32>
    %27 = vector.broadcast %26 : vector<1x64xf32> to vector<16x64xf32>
    %28 = arith.addf %25, %27 : vector<16x64xf32>
    %cst_13 = arith.constant 0.000000e+00 : f32
    %29 = vector.broadcast %cst_13 : f32 to vector<16x64xf32>
    %30 = arith.maximumf %28, %29 : vector<16x64xf32>
    %31 = vector.broadcast %cst_13 : f32 to vector<16x64xf32>
    %32 = arith.subf %28, %31 : vector<16x64xf32>
    %33 = arith.cmpf one, %32, %32 : vector<16x64xf32>
    %34 = vector.broadcast %cst_13 : f32 to vector<16x64xf32>
    %35 = arith.addf %28, %34 : vector<16x64xf32>
    %36 = math.absf %32 : vector<16x64xf32>
    %cst_14 = arith.constant 0.000000e+00 : f32
    %37 = vector.broadcast %cst_14 : f32 to vector<16x64xf32>
    %38 = arith.subf %37, %36 : vector<16x64xf32>
    %39 = math.exp %38 : vector<16x64xf32>
    %40 = math.log1p %39 : vector<16x64xf32>
    %41 = arith.addf %30, %40 : vector<16x64xf32>
    %42 = arith.select %33, %35, %41 : vector<16x64xi1>, vector<16x64xf32>
    %cst_15 = arith.constant 2.000000e+00 : f32
    %43 = math.log %cst_15 : f32
    %44 = vector.broadcast %43 : f32 to vector<16x64xf32>
    %45 = arith.subf %42, %44 : vector<16x64xf32>
    %c0_16 = arith.constant 0 : index
    %c0_17 = arith.constant 0 : index
    %46 = vector.load %arg6[%c0_16, %c0_17] : memref<1x64xf32, #tpu.memory_space<vmem>>, vector<1x64xf32>
    %47 = tpu.transpose %45, [1, 0] : vector<16x64xf32> -> vector<64x16xf32>
    %cst_18 = arith.constant dense<0.000000e+00> : vector<1x16xf32>
    %48 = tpu.matmul %46, %47, %cst_18 {dimension_numbers = #tpu.dot_dimension_numbers<[1], [0], [0], [1], [0, 0, 1, 1], [], []>} : vector<1x64xf32>, vector<64x16xf32>, vector<1x16xf32> -> vector<1x16xf32>
    %c0_19 = arith.constant 0 : index
    %49 = memref.load %arg7[%c0_19] : memref<1xf32, #tpu.memory_space<smem>>
    %50 = vector.broadcast %49 : f32 to vector<1x16xf32>
    %51 = arith.addf %48, %50 : vector<1x16xf32>
    %c0_20 = arith.constant 0 : index
    %c0_21 = arith.constant 0 : index
    %52 = vector.load %arg8[%c0_20, %c0_21] : memref<1x16xf32, #tpu.memory_space<vmem>>, vector<1x16xf32>
    tpu.vector_store %arg8[%c0_20, %c0_21], %51 {strides = array<i32>} : memref<1x16xf32, #tpu.memory_space<vmem>>, vector<1x16xf32>,
    return
  }
  func.func @transform_0(%arg0: i32) -> (i32, i32) {
    %c0_i32 = arith.constant 0 : i32
    %c0_i32_0 = arith.constant 0 : i32
    return %arg0, %c0_i32 : i32, i32
  }
  func.func @transform_1(%arg0: i32) -> (i32, i32) {
    %c0_i32 = arith.constant 0 : i32
    %c0_i32_0 = arith.constant 0 : i32
    %c0_i32_1 = arith.constant 0 : i32
    return %c0_i32, %c0_i32_0 : i32, i32
  }
  func.func @transform_2(%arg0: i32) -> (i32, i32) {
    %c0_i32 = arith.constant 0 : i32
    %c0_i32_0 = arith.constant 0 : i32
    %c0_i32_1 = arith.constant 0 : i32
    return %c0_i32, %c0_i32_0 : i32, i32
  }
  func.func @transform_3(%arg0: i32) -> (i32, i32) {
    %c0_i32 = arith.constant 0 : i32
    %c0_i32_0 = arith.constant 0 : i32
    %c0_i32_1 = arith.constant 0 : i32
    return %c0_i32, %c0_i32_0 : i32, i32
  }
  func.func @transform_4(%arg0: i32) -> (i32, i32) {
    %c0_i32 = arith.constant 0 : i32
    %c0_i32_0 = arith.constant 0 : i32
    %c0_i32_1 = arith.constant 0 : i32
    return %c0_i32, %c0_i32_0 : i32, i32
  }
  func.func @transform_5(%arg0: i32) -> (i32, i32) {
    %c0_i32 = arith.constant 0 : i32
    %c0_i32_0 = arith.constant 0 : i32
    %c0_i32_1 = arith.constant 0 : i32
    return %c0_i32, %c0_i32_0 : i32, i32
  }
  func.func @transform_6(%arg0: i32) -> i32 {
    %c0_i32 = arith.constant 0 : i32
    %c0_i32_0 = arith.constant 0 : i32
    return %c0_i32 : i32
  }
  func.func @transform_7(%arg0: i32) -> (i32, i32) {
    %c0_i32 = arith.constant 0 : i32
    %c0_i32_0 = arith.constant 0 : i32
    return %arg0, %c0_i32 : i32, i32
  }
}

</mosaic_0001>

<bundles_post_ra>
// kernel: tpu_custom_call.1
= control target key start
LH: loop header
LB: loop body
LE: loop exit
PB: predicated region body
PF: predicated region fallthrough
CT: control target
= control target key end

     0   :  { %v522_v1 = vmov 0.0   ;;  %vm523_vm0 = vmmov 0   ;;  %vm59_vm1 = vcmask 261120   ;;  %s623_s0 = inlined_call_operand.vmem [shape: bf16[16,32], index: 0, kind: input, shape index: {}]   ;;  %s624_s1 = inlined_call_operand.vmem [shape: bf16[32,128], index: 1, kind: input, shape index: {}]   ;;  %s625_s2 = inlined_call_operand.vmem [shape: f32[1,128], index: 2, kind: input, shape index: {}]   ;;  %s626_s3 = inlined_call_operand.vmem [shape: bf16[128,64], index: 3, kind: input, shape index: {}]   ;;  %s627_s4 = inlined_call_operand.vmem [shape: f32[1,64], index: 4, kind: input, shape index: {}]   ;;  %s628_s5 = inlined_call_operand.vmem [shape: f32[1,64], index: 5, kind: input, shape index: {}]   ;;  %s629_s6 = inlined_call_operand.<no memory space> [shape: f32[1], index: 6, kind: input, shape index: {}]   ;;  %s630_s7 = inlined_call_operand.hbm [shape: f32[1,16], index: 7, kind: output, shape index: {}]  }
   0x1   :  { %v471_v0 = vld [vmem:[%s624_s1] sm:$0xff]   ;;  %428 = vmatprep.subr.bf16.mxu0 %v522_v1  ;;  %436 = vmatprep.subr.bf16.mxu1 %v522_v1  ;;  %v472_v2 = vld [vmem:[%s624_s1 + $0x8] sm:$0xff]  }
   0x2   :  { %429 = vmatpush3.bf16.msra.mxu0 %v471_v0  ;;  %432 = vmatprep.mubr.msk.bf16.mxu0 %vm523_vm0, %v522_v1  ;;  %v473_v3 = vld [vmem:[%s623_s0] sm:$0xff]  }
   0x3   :  { %430 = vmatprep.subr.bf16.mxu0 %v522_v1  ;;  %452 = vmatprep.mubr.msk.bf16.mxu1 %vm523_vm0, %v522_v1 }
   0x6   :  { %431 = vmatpush3.bf16.msra.mxu0 %v472_v2 }
   0x7   :  { %13 = vsyncpa [#allocation4], 0  ;;  %v474_v4 = vld [vmem:[%s626_s3] sm:$0xff]   ;;  %v475_v5 = vld [vmem:[%s626_s3 + $0x8] sm:$0xff]   ;;  %v524_v52 = vmov 0.0|0.0   ;;  %vm296_vm10 = vcmask 523264  }
   0x8   :  { %437 = vmatpush3.bf16.msra.mxu1 %v474_v4  ;;  %v476_v6 = vld [vmem:[%s626_s3 + $0x10] sm:$0xff]   ;;  %v477_v7 = vld [vmem:[%s626_s3 + $0x18] sm:$0xff]   ;;  %v478_v8 = vld [vmem:[%s626_s3 + $0x20] sm:$0xff]   ;;  %463 = vmatprep.subr.bf16.mxu0 %v524_v52  ;;  %s525_s26 = smov [#allocation3]   ;;  %vm376_vm12 = vcmask 122880  }
   0x9   :  { %433 = vmatmul.mubr.msk.bf16.vlgmr.msra.gmra.mrb[0].mxu0 %vm59_vm1, %v473_v3  ;;  %438 = vmatprep.subr.bf16.mxu1 %v522_v1  ;;  %v479_v9 = vld [vmem:[%s626_s3 + $0x28] sm:$0xff]   ;;  %v480_v10 = vld [vmem:[%s626_s3 + $0x30] sm:$0xff]   ;;  %v481_v11 = vld [vmem:[%s626_s3 + $0x38] sm:$0xff]   ;;  %s384_s27 = sshll.u32 %s525_s26, 4  ;;  %s385_s27 = int_to_ptr.vmem [resolvable:$true] %s384_s27 }
   0xa   :  { %460 = vmatprep.mubr.msk.f32.mxu0 %vm523_vm0, %v522_v1  ;;  %v392_v12 = vld [vmem:[%s625_s2] ss:$0 sm:$0xff]  ;;  %vm465_vm11 = vmpackc.low %vm296_vm10, %vm296_vm10  ;;  %s498_s28 = scalar_lea.vmem %s385_s27, 16  ;;  %s502_s29 = scalar_lea.vmem %s385_s27, 32 }
   0xb   :  { %v399_v53 = vld [vmem:[%s627_s4] ss:$0 sm:$0xff]  ;;  %p499_p0 = scmp.ne.s32.totalorder %s385_s27, %s498_s28  ;;  %p503_p1 = scmp.lt.s32.totalorder %s385_s27, %s385_s27 }
   0xc   :  { %439 = vmatpush3.bf16.msra.mxu1 %v475_v5  ;;  %p504_p2 = scmp.lt.s32.totalorder %s502_s29, %s498_s28 }
   0xd   :  { %440 = vmatprep.subr.bf16.mxu1 %v522_v1 }
   0xe   :  { %p505_p3 = por %p504_p2, %p503_p1 }
  0x10   :  { %441 = vmatpush3.bf16.msra.mxu1 %v476_v6  ;;  %p506_p4 = pnand %p505_p3, %p499_p0 }
  0x11   :  { %442 = vmatprep.subr.bf16.mxu1 %v522_v1 }
  0x14   :  { %443 = vmatpush3.bf16.msra.mxu1 %v477_v7 }
  0x15   :  { %444 = vmatprep.subr.bf16.mxu1 %v522_v1 }
  0x18   :  { %445 = vmatpush3.bf16.msra.mxu1 %v478_v8 }
  0x19   :  { %446 = vmatprep.subr.bf16.mxu1 %v522_v1 }
  0x1c   :  { %447 = vmatpush3.bf16.msra.mxu1 %v479_v9 }
  0x1d   :  { %448 = vmatprep.subr.bf16.mxu1 %v522_v1 }
  0x20   :  { %449 = vmatpush3.bf16.msra.mxu1 %v480_v10 }
  0x21   :  { %450 = vmatprep.subr.bf16.mxu1 %v522_v1 }
  0x24   :  { %451 = vmatpush3.bf16.msra.mxu1 %v481_v11 }
  0xdc   :  { %v97_v13 = vpop.f32.mrb[0].mxu0 }
  0xdd   :  { %v98_v14 = vadd.f32 %v392_v12, %v97_v13  ;;  %v434_v15 = vpop.f32.mrb[1].mxu0 }
  0xde   :  { %v100_v16 = vpop.f32.mrb[2].mxu0 }
  0xdf   :  { %v110_v17 = vand.u32 2147483647, %v98_v14  ;;  %v101_v18 = vadd.f32 %v392_v12, %v100_v16  ;;  %v435_v19 = vpop.f32.mrb[3].mxu0  ;;  %v104_v39 = vmax.f32 %v98_v14, 0.0  ;;  %vm106_vm4 = vcmp.ne.f32.partialorder %v98_v14, %v98_v14 }
  0xe1   :  { %v112_v20 = vsub.f32 0.0, %v110_v17  ;;  %v111_v21 = vand.u32 2147483647, %v101_v18  ;;  %v105_v44 = vmax.f32 %v101_v18, 0.0  ;;  %vm107_vm5 = vcmp.ne.f32.partialorder %v101_v18, %v101_v18 }
  0xe3   :  { %v114_v22 = vmul.f32 1.442695, %v112_v20  ;;  %v113_v23 = vsub.f32 0.0, %v111_v21 }
  0xe5   :  { %482 = vpow2.f32 %v114_v22  ;;  %v116_v24 = vmul.f32 1.442695, %v113_v23 }
  0xe7   :  { %484 = vpow2.f32 %v116_v24 }
  0xef   :  { %v483_v25 = vpop.eup %482 }
  0xf0   :  { %v118_v26 = vadd.f32 1.0, %v483_v25  ;;  %v121_v29 = vmul.f32 -0.5, %v483_v25  ;;  %v124_v32 = vand.u32 2147483647, %v483_v25 }
  0xf1   :  { %v485_v27 = vpop.eup %484 }
  0xf2   :  { %486 = vlog2.f32 %v118_v26  ;;  %v127_v28 = vadd.f32 1.0, %v485_v27  ;;  %v130_v30 = vmul.f32 -0.5, %v485_v27  ;;  %v122_v31 = vadd.f32 1.0, %v121_v29  ;;  %v293_v29 = vld [vmem:[%s628_s5] sm:$0x1] }
  0xf3   :  { %v133_v35 = vand.u32 2147483647, %v485_v27  ;;  %vm125_vm2 = vcmp.lt.f32.partialorder %v124_v32, 0.0004427343 }
  0xf4   :  { %488 = vlog2.f32 %v127_v28  ;;  %v131_v33 = vadd.f32 1.0, %v130_v30  ;;  %v123_v37 = vmul.f32 %v483_v25, %v122_v31  ;;  %v295_v30 = vstv %s629_s6 }
  0xf5   :  { %vm134_vm3 = vcmp.lt.f32.partialorder %v133_v35, 0.0004427343 }
  0xf6   :  { %v132_v42 = vmul.f32 %v485_v27, %v131_v33 }
  0xfc   :  { %v487_v34 = vpop.eup %486 }
  0xfd   :  { %v120_v36 = vmul.f32 0.6931472, %v487_v34 }
  0xfe   :  { %v489_v38 = vpop.eup %488 }
  0xff   :  { %v126_v40 = vsel %vm125_vm2, %v123_v37, %v120_v36  ;;  %v129_v41 = vmul.f32 0.6931472, %v489_v38 }
 0x100   :  { %v136_v43 = vadd.f32 %v126_v40, %v104_v39 }
 0x101   :  { %v135_v45 = vsel %vm134_vm3, %v132_v42, %v129_v41 }
 0x102   :  { %v137_v46 = vadd.f32 %v135_v45, %v105_v44  ;;  %v138_v47 = vsel %vm106_vm4, %v98_v14, %v136_v43 }
 0x103   :  { %v397_v49 = vadd.f32 -0.6931472, %v138_v47 }
 0x104   :  { %v139_v48 = vsel %vm107_vm5, %v101_v18, %v137_v46 }
 0x105   :  { %v398_v50 = vadd.f32 -0.6931472, %v139_v48 }
 0x107   :  { %v142_v51 = vpack.c.bf16 %v398_v50, %v397_v49 }
 0x109   :  { %453 = vmatmul.mubr.bf16.vlgmr.msra.gmra.mrb[0].mxu1 %v142_v51 }
 0x1dc   :  { %v248_v54 = vpop.f32.mrb[0].mxu1 }
 0x1dd   :  { %v249_v55 = vadd.f32 %v399_v53, %v248_v54  ;;  %v454_v56 = vpop.f32.mrb[1].mxu1 }
 0x1de   :  { %v251_v57 = vpop.f32.mrb[2].mxu1 }
 0x1df   :  { %v261_v58 = vand.u32 2147483647, %v249_v55  ;;  %v252_v59 = vadd.f32 %v399_v53, %v251_v57  ;;  %v455_v60 = vpop.f32.mrb[3].mxu1  ;;  %v255_v16 = vmax.f32 %v249_v55, 0.0  ;;  %vm257_vm8 = vcmp.ne.f32.partialorder %v249_v55, %v249_v55 }
 0x1e1   :  { %v263_v61 = vsub.f32 0.0, %v261_v58  ;;  %v262_v62 = vand.u32 2147483647, %v252_v59  ;;  %v256_v21 = vmax.f32 %v252_v59, 0.0  ;;  %vm258_vm9 = vcmp.ne.f32.partialorder %v252_v59, %v252_v59 }
 0x1e3   :  { %v265_v63 = vmul.f32 1.442695, %v263_v61  ;;  %v264_v0 = vsub.f32 0.0, %v262_v62 }
 0x1e5   :  { %490 = vpow2.f32 %v265_v63  ;;  %v267_v1 = vmul.f32 1.442695, %v264_v0 }
 0x1e7   :  { %492 = vpow2.f32 %v267_v1 }
 0x1ef   :  { %v491_v2 = vpop.eup %490 }
 0x1f0   :  { %v269_v3 = vadd.f32 1.0, %v491_v2  ;;  %v272_v6 = vmul.f32 -0.5, %v491_v2  ;;  %v275_v9 = vand.u32 2147483647, %v491_v2 }
 0x1f1   :  { %v493_v4 = vpop.eup %492 }
 0x1f2   :  { %494 = vlog2.f32 %v269_v3  ;;  %v278_v5 = vadd.f32 1.0, %v493_v4  ;;  %v281_v7 = vmul.f32 -0.5, %v493_v4  ;;  %v273_v8 = vadd.f32 1.0, %v272_v6 }
 0x1f3   :  { %v284_v12 = vand.u32 2147483647, %v493_v4  ;;  %vm276_vm6 = vcmp.lt.f32.partialorder %v275_v9, 0.0004427343 }
 0x1f4   :  { %496 = vlog2.f32 %v278_v5  ;;  %v282_v10 = vadd.f32 1.0, %v281_v7  ;;  %v274_v14 = vmul.f32 %v491_v2, %v273_v8 }
 0x1f5   :  { %vm285_vm7 = vcmp.lt.f32.partialorder %v284_v12, 0.0004427343 }
 0x1f6   :  { %v283_v19 = vmul.f32 %v493_v4, %v282_v10 }
 0x1fc   :  { %v495_v11 = vpop.eup %494 }
 0x1fd   :  { %v271_v13 = vmul.f32 0.6931472, %v495_v11 }
 0x1fe   :  { %v497_v15 = vpop.eup %496 }
 0x1ff   :  { %v277_v17 = vsel %vm276_vm6, %v274_v14, %v271_v13  ;;  %v280_v18 = vmul.f32 0.6931472, %v497_v15 }
 0x200   :  { %v287_v20 = vadd.f32 %v277_v17, %v255_v16 }
 0x201   :  { %v286_v22 = vsel %vm285_vm7, %v283_v19, %v280_v18 }
 0x202   :  { %v289_v23 = vsel %vm257_vm8, %v249_v55, %v287_v20  ;;  %v288_v24 = vadd.f32 %v286_v22, %v256_v21 }
 0x203   :  { %v408_v26 = vadd.f32 -0.6931472, %v289_v23 }
 0x204   :  { %v290_v25 = vsel %vm258_vm9, %v252_v59, %v288_v24 }
 0x205   :  { %v409_v27 = vadd.f32 -0.6931472, %v290_v25 }
 0x207   :  { %v464_v28 = vpack.c.bf16 %v409_v27, %v408_v26 }
 0x209   :  { %466 = vmatpush3.bf16.xpose.msk.msra.mxu0 %vm465_vm11, %v464_v28 }
 0x210   :  { %461 = vmatmul.mubr.msk.f32.vlgmr.msra.gmra.mrb[4].mxu0 %vm296_vm10, %v293_v29 }
 0x2e3   :  { %v372_v31 = vpop.f32.mrb[4].mxu0 }
 0x2e4   :  { %v373_v32 = vadd.f32 %v372_v31, %v295_v30  ;;  %v462_v33 = vpop.f32.mrb[5].mxu0 }
 0x2e6   :  { %377 = vst.msk [vmem:[#allocation3] sm:$0x1] %vm376_vm12, %v373_v32 }
 0x2e7   :  { %509 = shalt.err (!%p506_p4)
}
 0x2e8   :  { %s510_s6 = scalar_lea.hbm %s630_s7, 16 }
 0x2e9   :  { %p511_p5 = scmp.ne.s32.totalorder %s630_s7, %s510_s6  ;;  %p514_p6 = scmp.lt.u32.totalorder %s510_s6, %s630_s7 }
 0x2eb   :  { %p516_p7 = pnand %p514_p6, %p511_p5 }
 0x2ed   :  { %519 = shalt.err (!%p516_p7)
}
 0x2ee   :  { %387 = dma.vmem_to_hbm [thread:$0]  %s385_s27, 16, %s630_s7, [#allocation4]  }
 0x2ef   :  { %520 = dma.done.wait [#allocation4], 16  }
 0x2f0   :  { %521 = vsyncadd [#allocation4], 4294967280 }
 0x2f1   :  { %391 = vsyncpa [#allocation4], 1 }

</bundles_post_ra>
